<compile_context>
chip_gen: v7x
topology: tpu7x:2x2x1
jax: 0.10.0
libtpu: 0.0.40
codegen_flags: <defaults>
</compile_context>

<pallas_src>
import jax
import jax.numpy as jnp
from jax import lax
from jax.experimental import pallas as pl
from jax.experimental.pallas import tpu as pltpu

LANES = 128
SUBLANES = 8
ROW_ALIGN = 32          # covers f32 (8), bf16 (16) and int8/bool (32) sublane packing
MAX_BLOCK_ROWS = 4096   # (4096,128) f32 = 2 MiB/input/step; 8 MiB double-buffered


def _round_up(x, m):
    return (x + m - 1) // m * m


def _num_tensorcores():
    """TensorCores per chip: 1 on v5e/v6e, 2 on megacore-style parts (v7x).

    Conservative: falls back to 1 if the info object doesn't expose an
    unambiguous per-chip TensorCore count.
    """
    try:
        info = pltpu.get_tpu_info()
    except Exception:
        return 1
    for name in ("tensorcores_per_chip", "num_tensorcores", "num_tensor_cores",
                 "tensor_cores_per_chip", "cores_per_chip"):
        try:
            v = int(getattr(info, name))
        except (AttributeError, TypeError, ValueError):
            continue
        if 1 <= v <= 8:
            return v
    return 1


def _make_kernel(n_valid, block_rows, tiles_per_core, first_masked_tile):
    bn = block_rows // SUBLANES
    full_rows = n_valid // LANES     # rows made entirely of valid elements
    tail_cols = n_valid % LANES      # valid lanes in the single partial row (if any)

    def kernel(pred_ref, true_ref, s1_ref, s2_ref, mx_ref):
        c = pl.program_id(0)           # core split axis
        i = pl.program_id(1)           # reduction axis ("arbitrary", last)
        g = c * tiles_per_core + i     # logical (unclamped) global tile index

        @pl.when(i == 0)
        def _():
            s1_ref[...] = jnp.zeros_like(s1_ref)
            s2_ref[...] = jnp.zeros_like(s2_ref)
            mx_ref[...] = jnp.full_like(mx_ref, -jnp.inf)

        # Native-dtype load (f32 / bf16 / uint8 / bool ...), f32 compute.
        p_raw = pred_ref[...].astype(jnp.float32)
        t_raw = true_ref[...].astype(jnp.float32)

        def accumulate(p, t, t_for_max):
            # nn.BCELoss clamps each log term at -100 before the multiply.
            log_p = jnp.maximum(jnp.log(p), -100.0)
            log_1mp = jnp.maximum(jnp.log(1.0 - p), -100.0)
            # Per-lane partial sums into resident (8,128) accumulators.  The
            # (bn, 8, 128) view does not cross (8,128) tiles, so this lowers to
            # plain vreg adds (no VMEM round trip).
            s1_ref[...] += jnp.sum(log_1mp.reshape(bn, SUBLANES, LANES), axis=0)
            s2_ref[...] += jnp.sum(
                (t * (log_p - log_1mp)).reshape(bn, SUBLANES, LANES), axis=0)
            mx_ref[...] = jnp.maximum(
                mx_ref[...],
                jnp.max(t_for_max.reshape(bn, SUBLANES, LANES), axis=0))

        # Fast path: every element of this tile is a valid input element.
        @pl.when(g < first_masked_tile)
        def _():
            accumulate(p_raw, t_raw, t_raw)

        # Tail path: tile contains padded / garbage / out-of-range positions.
        # Masked positions contribute exactly 0 to S1/S2 and -inf to the max.
        @pl.when(g >= first_masked_tile)
        def _():
            row = g * block_rows + lax.broadcasted_iota(
                jnp.int32, (block_rows, LANES), 0)
            valid = row < full_rows
            if tail_cols:   # static: only materialize the column iota if needed
                col = lax.broadcasted_iota(jnp.int32, (block_rows, LANES), 1)
                valid = valid | ((row == full_rows) & (col < tail_cols))
            p = jnp.where(valid, p_raw, 0.0)   # log(1-0)=0 and t=0 -> zero contribution
            t = jnp.where(valid, t_raw, 0.0)
            t_mx = jnp.where(valid, t_raw, -jnp.inf)
            accumulate(p, t, t_mx)

    return kernel


def bce_loss(mask_pred, mask_true):
    """JAX/Pallas equivalent of the PyTorch BCELoss module's forward."""
    pred = mask_pred.reshape(-1)     # free bitcast reshape; native dtype kept
    true = mask_true.reshape(-1)
    # nn.BCELoss requires matching element counts (i.e. pred channel dim == 1).
    assert pred.shape == true.shape, "flattened pred/true must match (C must be 1)"
    n = pred.shape[0]

    rows_exact = pl.cdiv(n, LANES)
    if rows_exact <= MAX_BLOCK_ROWS:
        # Small input (< ~2 MiB f32): one block covering everything; a tiny pad
        # keeps the block sublane-aligned for every input dtype and is far
        # cheaper than per-tile bookkeeping at this size.
        rows_total = _round_up(rows_exact, ROW_ALIGN)
        block_rows = rows_total
    else:
        rows_total = rows_exact
        block_rows = MAX_BLOCK_ROWS

    n_padded = rows_total * LANES
    if n_padded != n:
        # TODO(synk): large inputs whose element count is not a multiple of 128
        # still pay a full HBM pad copy here; avoiding it would need a manual-DMA
        # 1-D path.  Segmentation tensors (B*C*H*W) are essentially always aligned.
        pred = jnp.pad(pred, (0, n_padded - n), constant_values=0)
        true = jnp.pad(true, (0, n_padded - n), constant_values=0)
    pred2 = pred.reshape(rows_total, LANES)
    true2 = true.reshape(rows_total, LANES)

    tiles = pl.cdiv(rows_total, block_rows)
    tile_elems = block_rows * LANES
    first_masked_tile = n // tile_elems    # tiles before this are fully valid

    num_cores = _num_tensorcores()
    num_splits = num_cores if (num_cores > 1 and tiles >= num_cores) else 1
    tiles_per_core = pl.cdiv(tiles, num_splits)

    if num_splits > 1 and hasattr(pltpu, "CORE_PARALLEL"):
        dim_sem = (pltpu.CORE_PARALLEL, pltpu.ARBITRARY)
    elif num_splits > 1:
        dim_sem = ("parallel", "arbitrary")
    else:
        dim_sem = ("arbitrary", "arbitrary")

    # Clamp so tiles past the end (uneven core split) just re-read a valid block;
    # the kernel's g-based mask zeroes their contribution.
    def in_map(c, i):
        return (jnp.minimum(c * tiles_per_core + i, tiles - 1), 0)

    out_map = lambda c, i: (c, 0)
    acc_shape = jax.ShapeDtypeStruct((num_splits * SUBLANES, LANES), jnp.float32)

    bytes_accessed = (pred2.size * pred2.dtype.itemsize
                      + true2.size * true2.dtype.itemsize
                      + 3 * num_splits * SUBLANES * LANES * 4)

    s1, s2, mx = pl.pallas_call(
        _make_kernel(n, block_rows, tiles_per_core, first_masked_tile),
        out_shape=(acc_shape, acc_shape, acc_shape),
        grid=(num_splits, tiles_per_core),
        in_specs=[
            pl.BlockSpec((block_rows, LANES), in_map),
            pl.BlockSpec((block_rows, LANES), in_map),
        ],
        out_specs=(
            pl.BlockSpec((SUBLANES, LANES), out_map),
            pl.BlockSpec((SUBLANES, LANES), out_map),
            pl.BlockSpec((SUBLANES, LANES), out_map),
        ),
        compiler_params=pltpu.CompilerParams(
            dimension_semantics=dim_sem,
            vmem_limit_bytes=32 * 1024 * 1024),
        cost_estimate=pl.CostEstimate(
            flops=8 * n_padded,
            transcendentals=2 * n_padded,
            bytes_accessed=bytes_accessed),
    )(pred2, true2)

    s1_tot = jnp.sum(s1)
    s2_tot = jnp.sum(s2)
    maxv = jnp.max(mx)  # NOTE: all-zero target -> 0/0 (NaN), same as the reference
    # loss = mean( -(t*log p + (1-t)*log(1-p)) ),  t = true / max(true)
    return -(s1_tot + s2_tot / maxv) / n


def _bce_loss_ref(mask_pred, mask_true):
    """Pure-JAX reference of the PyTorch forward."""
    p = mask_pred.astype(jnp.float32).reshape(-1)
    mt = mask_true.astype(jnp.float32)
    t = mt.reshape(-1) / jnp.max(mt)
    log_p = jnp.maximum(jnp.log(p), -100.0)
    log_1mp = jnp.maximum(jnp.log(1.0 - p), -100.0)
    return jnp.mean(-(t * log_p + (1.0 - t) * log_1mp))


if __name__ == "__main__":
    B, C, H, W = 2, 1, 16, 16   # single-class segmentation -> C == 1
    key = jax.random.PRNGKey(0)
    kp, kt = jax.random.split(key)

    # Predictions already passed through a sigmoid (values in (0, 1)).
    mask_pred = jax.nn.sigmoid(jax.random.normal(kp, (B, C, H, W), dtype=jnp.float32))
    # Unnormalized "true" mask values in [0, 2]; the module normalizes by its max.
    mask_true = jax.random.uniform(kt, (B, 1, H, W), dtype=jnp.float32,
                                   minval=0.0, maxval=2.0)

    out = jax.block_until_ready(bce_loss(mask_pred, mask_true))
    ref = jax.block_until_ready(_bce_loss_ref(mask_pred, mask_true))
    assert out.shape == (), f"expected scalar loss, got shape {out.shape}"
    assert jnp.allclose(out, ref, rtol=1e-5, atol=1e-5), (out, ref)

    # Native-dtype path (no wrapper casts): bf16 predictions stream at half the
    # HBM bytes and are cast to f32 inside the kernel.  uint8/bool masks take
    # the same in-kernel-cast path.
    pred_bf16 = mask_pred.astype(jnp.bfloat16)
    out2 = jax.block_until_ready(bce_loss(pred_bf16, mask_true))
    ref2 = jax.block_until_ready(_bce_loss_ref(pred_bf16, mask_true))
    assert jnp.allclose(out2, ref2, rtol=1e-4, atol=1e-4), (out2, ref2)

    print("KERNEL_OK")
</pallas_src>

<mosaic_0001>
module attributes {stable_mosaic.version = 11 : i64} {
  func.func @kernel(%arg0: i32, %arg1: i32, %arg2: memref<32x128xf32, #tpu.memory_space<vmem>>, %arg3: memref<32x128xf32, #tpu.memory_space<vmem>>, %arg4: memref<8x128xf32, #tpu.memory_space<vmem>>, %arg5: memref<8x128xf32, #tpu.memory_space<vmem>>, %arg6: memref<8x128xf32, #tpu.memory_space<vmem>>) attributes {dimension_semantics = [#tpu.dimension_semantics<arbitrary>, #tpu.dimension_semantics<arbitrary>], iteration_bounds = array<i64: 1, 1>, scalar_prefetch = 0 : i64, scratch_operands = 0 : i64, tpu.core_type = #tpu.core_type<tc>, window_params = [{transform_indices = @transform_0, window_bounds = array<i64: 32, 128>}, {transform_indices = @transform_1, window_bounds = array<i64: 32, 128>}, {transform_indices = @transform_2, window_bounds = array<i64: 8, 128>}, {transform_indices = @transform_3, window_bounds = array<i64: 8, 128>}, {transform_indices = @transform_4, window_bounds = array<i64: 8, 128>}]} {
    %c1_i32 = arith.constant 1 : i32
    %0 = arith.muli %arg0, %c1_i32 : i32
    %1 = arith.addi %0, %arg1 : i32
    %c0_i32 = arith.constant 0 : i32
    %2 = arith.cmpi eq, %arg1, %c0_i32 : i32
    %3 = arith.extui %2 : i1 to i32
    %c0_i32_0 = arith.constant 0 : i32
    %4 = arith.cmpi ne, %3, %c0_i32_0 : i32
    scf.if %4 {
      %cst = arith.constant 0.000000e+00 : f32
      %13 = vector.broadcast %cst : f32 to vector<8x128xf32>
      %c0_8 = arith.constant 0 : index
      %c0_9 = arith.constant 0 : index
      %14 = vector.load %arg4[%c0_8, %c0_9] : memref<8x128xf32, #tpu.memory_space<vmem>>, vector<8x128xf32>
      tpu.vector_store %arg4[%c0_8, %c0_9], %13 {strides = array<i32>} : memref<8x128xf32, #tpu.memory_space<vmem>>, vector<8x128xf32>,
      %cst_10 = arith.constant 0.000000e+00 : f32
      %15 = vector.broadcast %cst_10 : f32 to vector<8x128xf32>
      %c0_11 = arith.constant 0 : index
      %c0_12 = arith.constant 0 : index
      %16 = vector.load %arg5[%c0_11, %c0_12] : memref<8x128xf32, #tpu.memory_space<vmem>>, vector<8x128xf32>
      tpu.vector_store %arg5[%c0_11, %c0_12], %15 {strides = array<i32>} : memref<8x128xf32, #tpu.memory_space<vmem>>, vector<8x128xf32>,
      %cst_13 = arith.constant 0xFF800000 : f32
      %17 = vector.broadcast %cst_13 : f32 to vector<8x128xf32>
      %c0_14 = arith.constant 0 : index
      %c0_15 = arith.constant 0 : index
      %18 = vector.load %arg6[%c0_14, %c0_15] : memref<8x128xf32, #tpu.memory_space<vmem>>, vector<8x128xf32>
      tpu.vector_store %arg6[%c0_14, %c0_15], %17 {strides = array<i32>} : memref<8x128xf32, #tpu.memory_space<vmem>>, vector<8x128xf32>,
    } else {
    }
    %c0 = arith.constant 0 : index
    %c0_1 = arith.constant 0 : index
    %5 = vector.load %arg2[%c0, %c0_1] : memref<32x128xf32, #tpu.memory_space<vmem>>, vector<32x128xf32>
    %c0_2 = arith.constant 0 : index
    %c0_3 = arith.constant 0 : index
    %6 = vector.load %arg3[%c0_2, %c0_3] : memref<32x128xf32, #tpu.memory_space<vmem>>, vector<32x128xf32>
    %c0_i32_4 = arith.constant 0 : i32
    %7 = arith.cmpi slt, %1, %c0_i32_4 : i32
    %8 = arith.extui %7 : i1 to i32
    %c0_i32_5 = arith.constant 0 : i32
    %9 = arith.cmpi ne, %8, %c0_i32_5 : i32
    scf.if %9 {
      %13 = math.log %5 : vector<32x128xf32>
      %cst = arith.constant -1.000000e+02 : f32
      %14 = vector.broadcast %cst : f32 to vector<32x128xf32>
      %15 = arith.maximumf %13, %14 : vector<32x128xf32>
      %cst_8 = arith.constant 1.000000e+00 : f32
      %16 = vector.broadcast %cst_8 : f32 to vector<32x128xf32>
      %17 = arith.subf %16, %5 : vector<32x128xf32>
      %18 = math.log %17 : vector<32x128xf32>
      %cst_9 = arith.constant -1.000000e+02 : f32
      %19 = vector.broadcast %cst_9 : f32 to vector<32x128xf32>
      %20 = arith.maximumf %18, %19 : vector<32x128xf32>
      %c0_10 = arith.constant 0 : index
      %c0_11 = arith.constant 0 : index
      %21 = vector.load %arg4[%c0_10, %c0_11] : memref<8x128xf32, #tpu.memory_space<vmem>>, vector<8x128xf32>
      %22 = vector.shape_cast %20 : vector<32x128xf32> to vector<4x8x128xf32>
      %cst_12 = arith.constant dense<0.000000e+00> : vector<8x128xf32>
      %23 = vector.multi_reduction <add>, %22, %cst_12 [0] : vector<4x8x128xf32> to vector<8x128xf32>
      %24 = arith.addf %21, %23 : vector<8x128xf32>
      %c0_13 = arith.constant 0 : index
      %c0_14 = arith.constant 0 : index
      %25 = vector.load %arg4[%c0_13, %c0_14] : memref<8x128xf32, #tpu.memory_space<vmem>>, vector<8x128xf32>
      tpu.vector_store %arg4[%c0_13, %c0_14], %24 {strides = array<i32>} : memref<8x128xf32, #tpu.memory_space<vmem>>, vector<8x128xf32>,
      %c0_15 = arith.constant 0 : index
      %c0_16 = arith.constant 0 : index
      %26 = vector.load %arg5[%c0_15, %c0_16] : memref<8x128xf32, #tpu.memory_space<vmem>>, vector<8x128xf32>
      %27 = arith.subf %15, %20 : vector<32x128xf32>
      %28 = arith.mulf %6, %27 : vector<32x128xf32>
      %29 = vector.shape_cast %28 : vector<32x128xf32> to vector<4x8x128xf32>
      %cst_17 = arith.constant dense<0.000000e+00> : vector<8x128xf32>
      %30 = vector.multi_reduction <add>, %29, %cst_17 [0] : vector<4x8x128xf32> to vector<8x128xf32>
      %31 = arith.addf %26, %30 : vector<8x128xf32>
      %c0_18 = arith.constant 0 : index
      %c0_19 = arith.constant 0 : index
      %32 = vector.load %arg5[%c0_18, %c0_19] : memref<8x128xf32, #tpu.memory_space<vmem>>, vector<8x128xf32>
      tpu.vector_store %arg5[%c0_18, %c0_19], %31 {strides = array<i32>} : memref<8x128xf32, #tpu.memory_space<vmem>>, vector<8x128xf32>,
      %c0_20 = arith.constant 0 : index
      %c0_21 = arith.constant 0 : index
      %33 = vector.load %arg6[%c0_20, %c0_21] : memref<8x128xf32, #tpu.memory_space<vmem>>, vector<8x128xf32>
      %34 = vector.shape_cast %6 : vector<32x128xf32> to vector<4x8x128xf32>
      %cst_22 = arith.constant dense<0xFF800000> : vector<8x128xf32>
      %35 = vector.multi_reduction <maximumf>, %34, %cst_22 [0] : vector<4x8x128xf32> to vector<8x128xf32>
      %36 = arith.maximumf %33, %35 : vector<8x128xf32>
      %c0_23 = arith.constant 0 : index
      %c0_24 = arith.constant 0 : index
      %37 = vector.load %arg6[%c0_23, %c0_24] : memref<8x128xf32, #tpu.memory_space<vmem>>, vector<8x128xf32>
      tpu.vector_store %arg6[%c0_23, %c0_24], %36 {strides = array<i32>} : memref<8x128xf32, #tpu.memory_space<vmem>>, vector<8x128xf32>,
    } else {
    }
    %c0_i32_6 = arith.constant 0 : i32
    %10 = arith.cmpi sge, %1, %c0_i32_6 : i32
    %11 = arith.extui %10 : i1 to i32
    %c0_i32_7 = arith.constant 0 : i32
    %12 = arith.cmpi ne, %11, %c0_i32_7 : i32
    scf.if %12 {
      %c32_i32 = arith.constant 32 : i32
      %13 = arith.muli %1, %c32_i32 : i32
      %14 = tpu.iota {dimensions = array<i32: 0>} : vector<32x128xi32>
      %15 = vector.broadcast %13 : i32 to vector<32x128xi32>
      %16 = arith.addi %15, %14 : vector<32x128xi32>
      %c4_i32 = arith.constant 4 : i32
      %17 = vector.broadcast %c4_i32 : i32 to vector<32x128xi32>
      %18 = arith.cmpi slt, %16, %17 : vector<32x128xi32>
      %cst = arith.constant 0.000000e+00 : f32
      %19 = vector.broadcast %cst : f32 to vector<32x128xf32>
      %20 = arith.select %18, %5, %19 : vector<32x128xi1>, vector<32x128xf32>
      %cst_8 = arith.constant 0.000000e+00 : f32
      %21 = vector.broadcast %cst_8 : f32 to vector<32x128xf32>
      %22 = arith.select %18, %6, %21 : vector<32x128xi1>, vector<32x128xf32>
      %cst_9 = arith.constant 0xFF800000 : f32
      %23 = vector.broadcast %cst_9 : f32 to vector<32x128xf32>
      %24 = arith.select %18, %6, %23 : vector<32x128xi1>, vector<32x128xf32>
      %25 = math.log %20 : vector<32x128xf32>
      %cst_10 = arith.constant -1.000000e+02 : f32
      %26 = vector.broadcast %cst_10 : f32 to vector<32x128xf32>
      %27 = arith.maximumf %25, %26 : vector<32x128xf32>
      %cst_11 = arith.constant 1.000000e+00 : f32
      %28 = vector.broadcast %cst_11 : f32 to vector<32x128xf32>
      %29 = arith.subf %28, %20 : vector<32x128xf32>
      %30 = math.log %29 : vector<32x128xf32>
      %cst_12 = arith.constant -1.000000e+02 : f32
      %31 = vector.broadcast %cst_12 : f32 to vector<32x128xf32>
      %32 = arith.maximumf %30, %31 : vector<32x128xf32>
      %c0_13 = arith.constant 0 : index
      %c0_14 = arith.constant 0 : index
      %33 = vector.load %arg4[%c0_13, %c0_14] : memref<8x128xf32, #tpu.memory_space<vmem>>, vector<8x128xf32>
      %34 = vector.shape_cast %32 : vector<32x128xf32> to vector<4x8x128xf32>
      %cst_15 = arith.constant dense<0.000000e+00> : vector<8x128xf32>
      %35 = vector.multi_reduction <add>, %34, %cst_15 [0] : vector<4x8x128xf32> to vector<8x128xf32>
      %36 = arith.addf %33, %35 : vector<8x128xf32>
      %c0_16 = arith.constant 0 : index
      %c0_17 = arith.constant 0 : index
      %37 = vector.load %arg4[%c0_16, %c0_17] : memref<8x128xf32, #tpu.memory_space<vmem>>, vector<8x128xf32>
      tpu.vector_store %arg4[%c0_16, %c0_17], %36 {strides = array<i32>} : memref<8x128xf32, #tpu.memory_space<vmem>>, vector<8x128xf32>,
      %c0_18 = arith.constant 0 : index
      %c0_19 = arith.constant 0 : index
      %38 = vector.load %arg5[%c0_18, %c0_19] : memref<8x128xf32, #tpu.memory_space<vmem>>, vector<8x128xf32>
      %39 = arith.subf %27, %32 : vector<32x128xf32>
      %40 = arith.mulf %22, %39 : vector<32x128xf32>
      %41 = vector.shape_cast %40 : vector<32x128xf32> to vector<4x8x128xf32>
      %cst_20 = arith.constant dense<0.000000e+00> : vector<8x128xf32>
      %42 = vector.multi_reduction <add>, %41, %cst_20 [0] : vector<4x8x128xf32> to vector<8x128xf32>
      %43 = arith.addf %38, %42 : vector<8x128xf32>
      %c0_21 = arith.constant 0 : index
      %c0_22 = arith.constant 0 : index
      %44 = vector.load %arg5[%c0_21, %c0_22] : memref<8x128xf32, #tpu.memory_space<vmem>>, vector<8x128xf32>
      tpu.vector_store %arg5[%c0_21, %c0_22], %43 {strides = array<i32>} : memref<8x128xf32, #tpu.memory_space<vmem>>, vector<8x128xf32>,
      %c0_23 = arith.constant 0 : index
      %c0_24 = arith.constant 0 : index
      %45 = vector.load %arg6[%c0_23, %c0_24] : memref<8x128xf32, #tpu.memory_space<vmem>>, vector<8x128xf32>
      %46 = vector.shape_cast %24 : vector<32x128xf32> to vector<4x8x128xf32>
      %cst_25 = arith.constant dense<0xFF800000> : vector<8x128xf32>
      %47 = vector.multi_reduction <maximumf>, %46, %cst_25 [0] : vector<4x8x128xf32> to vector<8x128xf32>
      %48 = arith.maximumf %45, %47 : vector<8x128xf32>
      %c0_26 = arith.constant 0 : index
      %c0_27 = arith.constant 0 : index
      %49 = vector.load %arg6[%c0_26, %c0_27] : memref<8x128xf32, #tpu.memory_space<vmem>>, vector<8x128xf32>
      tpu.vector_store %arg6[%c0_26, %c0_27], %48 {strides = array<i32>} : memref<8x128xf32, #tpu.memory_space<vmem>>, vector<8x128xf32>,
    } else {
    }
    return
  }
  func.func @transform_0(%arg0: i32, %arg1: i32) -> (i32, i32) {
    %c1_i32 = arith.constant 1 : i32
    %0 = arith.muli %arg0, %c1_i32 : i32
    %1 = arith.addi %0, %arg1 : i32
    %c0_i32 = arith.constant 0 : i32
    %2 = arith.minsi %1, %c0_i32 : i32
    %c0_i32_0 = arith.constant 0 : i32
    %c0_i32_1 = arith.constant 0 : i32
    return %2, %c0_i32_0 : i32, i32
  }
  func.func @transform_1(%arg0: i32, %arg1: i32) -> (i32, i32) {
    %c1_i32 = arith.constant 1 : i32
    %0 = arith.muli %arg0, %c1_i32 : i32
    %1 = arith.addi %0, %arg1 : i32
    %c0_i32 = arith.constant 0 : i32
    %2 = arith.minsi %1, %c0_i32 : i32
    %c0_i32_0 = arith.constant 0 : i32
    %c0_i32_1 = arith.constant 0 : i32
    return %2, %c0_i32_0 : i32, i32
  }
  func.func @transform_2(%arg0: i32, %arg1: i32) -> (i32, i32) {
    %c0_i32 = arith.constant 0 : i32
    %c0_i32_0 = arith.constant 0 : i32
    return %arg0, %c0_i32 : i32, i32
  }
  func.func @transform_3(%arg0: i32, %arg1: i32) -> (i32, i32) {
    %c0_i32 = arith.constant 0 : i32
    %c0_i32_0 = arith.constant 0 : i32
    return %arg0, %c0_i32 : i32, i32
  }
  func.func @transform_4(%arg0: i32, %arg1: i32) -> (i32, i32) {
    %c0_i32 = arith.constant 0 : i32
    %c0_i32_0 = arith.constant 0 : i32
    return %arg0, %c0_i32 : i32, i32
  }
}

</mosaic_0001>

<bundles_post_ra>
// kernel: tpu_custom_call.1
= control target key start
LH: loop header
LB: loop body
LE: loop exit
PB: predicated region body
PF: predicated region fallthrough
CT: control target
= control target key end

     0   :  { %10 = vsyncpa [#allocation3], 0  ;;  %s496_s0 = inlined_call_operand.hbm [shape: f32[32,128], index: 0, kind: input, shape index: {}]   ;;  %s497_s1 = inlined_call_operand.hbm [shape: f32[32,128], index: 1, kind: input, shape index: {}]   ;;  %s498_s2 = inlined_call_operand.hbm [shape: f32[8,128], index: 2, kind: output, shape index: {0}]   ;;  %s499_s3 = inlined_call_operand.hbm [shape: f32[8,128], index: 3, kind: output, shape index: {1}]   ;;  %s500_s4 = inlined_call_operand.hbm [shape: f32[8,128], index: 4, kind: output, shape index: {2}]  }
   0x1   :  { %11 = vsyncpa [#allocation6], 0 }
   0x2   :  { %12 = vsyncpa [#allocation4], 0 }
   0x3   :  { %13 = vsyncpa [#allocation9], 0  ;;  %s401_s15 = smov [#allocation2]   ;;  %s283_s19 = scalar_lea.hbm %s496_s0, 512 }
   0x4   :  { %s25_s16 = sshll.u32 %s401_s15, 4  ;;  %p284_p0 = scmp.ne.s32.totalorder %s496_s0, %s283_s19  ;;  %s26_s16 = int_to_ptr.vmem [resolvable:$true] %s25_s16 }
   0x5   :  { %p287_p1 = scmp.lt.u32.totalorder %s283_s19, %s496_s0 }
   0x7   :  { %p289_p2 = pnand %p287_p1, %p284_p0 }
   0x9   :  { %292 = shalt.err (!%p289_p2)
}
   0xa   :  { %s293_s24 = scalar_lea.vmem %s26_s16, 512  ;;  %p298_p4 = scmp.lt.s32.totalorder %s26_s16, %s26_s16 }
   0xb   :  { %p294_p3 = scmp.ne.s32.totalorder %s26_s16, %s293_s24  ;;  %p299_p5 = scmp.lt.s32.totalorder %s293_s24, %s293_s24 }
   0xd   :  { %p300_p6 = por %p299_p5, %p298_p4 }
   0xf   :  { %p301_p7 = pnand %p300_p6, %p294_p3 }
  0x11   :  { %304 = shalt.err (!%p301_p7)
}
  0x12   :  { %s402_s25 = smov 128   ;;  %s403_s26 = smov 8  }
  0x13   :  { %31 = dma.hbm_to_vmem [thread:$0]  %s496_s0, 512, %s26_s16, [#allocation3], %s402_s25, %s402_s25, %s403_s26  }
  0x14   :  { %s404_s29 = smov [#allocation5]   ;;  %s305_s7 = scalar_lea.hbm %s497_s1, 512 }
  0x15   :  { %s43_s30 = sshll.u32 %s404_s29, 4  ;;  %p306_p8 = scmp.ne.s32.totalorder %s497_s1, %s305_s7  ;;  %s44_s30 = int_to_ptr.vmem [resolvable:$true] %s43_s30 }
  0x16   :  { %p309_p9 = scmp.lt.u32.totalorder %s305_s7, %s497_s1 }
  0x18   :  { %p311_p10 = pnand %p309_p9, %p306_p8 }
  0x1a   :  { %314 = shalt.err (!%p311_p10)
}
  0x1b   :  { %s315_s12 = scalar_lea.vmem %s44_s30, 512  ;;  %p320_p12 = scmp.lt.s32.totalorder %s44_s30, %s44_s30 }
  0x1c   :  { %p316_p11 = scmp.ne.s32.totalorder %s44_s30, %s315_s12  ;;  %p321_p13 = scmp.lt.s32.totalorder %s315_s12, %s315_s12 }
  0x1e   :  { %p322_p0 = por %p321_p13, %p320_p12 }
  0x20   :  { %p323_p1 = pnand %p322_p0, %p316_p11 }
  0x22   :  { %326 = shalt.err (!%p323_p1)
}
  0x23   :  { %49 = dma.hbm_to_vmem [thread:$0]  %s497_s1, 512, %s44_s30, [#allocation6], %s402_s25, %s402_s25, %s403_s26  }
  0x24   :  { %393 = dma.done.wait [#allocation3], 512  }
  0x25   :  { %394 = vsyncadd [#allocation3], 4294966784 }
  0x26   :  { %395 = dma.done.wait [#allocation6], 512  }
  0x27   :  { %396 = vsyncadd [#allocation6], 4294966784  ;;  %v143_v0 = vlaneseq  ;;  %v72_v2 = vld [vmem:[#allocation2] sm:$0xff]  ;;  %s405_s1 = smov [#allocation7]   ;;  %s406_s15 = smov [#allocation8]  }
  0x28   :  { %v76_v3 = vld [vmem:[#allocation5] sm:$0xff]  ;;  %s229_s14 = sshll.u32 %s405_s1, 4  ;;  %s239_s16 = sshll.u32 %s406_s15, 4  ;;  %s230_s14 = int_to_ptr.vmem [resolvable:$true] %s229_s14  ;;  %s240_s16 = int_to_ptr.vmem [resolvable:$true] %s239_s16 }
  0x29   :  { %v144_v1 = vshrl.u32 %v143_v0, 7  ;;  %s407_s17 = smov [#allocation10]   ;;  %s327_s19 = scalar_lea.vmem %s230_s14, 128 }
  0x2a   :  { %s249_s18 = sshll.u32 %s407_s17, 4  ;;  %p328_p2 = scmp.ne.s32.totalorder %s230_s14, %s327_s19  ;;  %s250_s18 = int_to_ptr.vmem [resolvable:$true] %s249_s18 }
  0x2b   :  { %vm153_vm0 = vcmp.lt.s32.totalorder %v144_v1, 4  ;;  %p332_p3 = scmp.lt.s32.totalorder %s230_s14, %s230_s14  ;;  %p333_p4 = scmp.lt.s32.totalorder %s327_s19, %s327_s19 }
  0x2c   :  { %v157_v4 = vsel %vm153_vm0, %v72_v2, 0.0  ;;  %v165_v5 = vsel %vm153_vm0, %v76_v3, -inf  ;;  %v161_v13 = vsel %vm153_vm0, %v76_v3, 0.0 }
  0x2d   :  { %279 = vlog2.f32 %v157_v4  ;;  %v181_v6 = vsub.f32 1.0, %v157_v4  ;;  %222 = vst [vmem:[#allocation10] sm:$0xff] %v165_v5  ;;  %p334_p5 = por %p333_p4, %p332_p3 }
  0x2f   :  { %281 = vlog2.f32 %v181_v6  ;;  %p335_p6 = pnand %p334_p5, %p328_p2 }
  0x37   :  { %v280_v7 = vpop.eup %279 }
  0x38   :  { %v170_v8 = vmul.f32 0.6931472, %v280_v7 }
  0x39   :  { %v282_v9 = vpop.eup %281 }
  0x3a   :  { %v177_v10 = vmax.f32 %v170_v8, -100.0  ;;  %v186_v11 = vmul.f32 0.6931472, %v282_v9 }
  0x3c   :  { %v193_v12 = vmax.f32 %v186_v11, -100.0 }
  0x3e   :  { %v204_v14 = vsub.f32 %v177_v10, %v193_v12  ;;  %202 = vst [vmem:[#allocation7] sm:$0xff] %v193_v12 }
  0x40   :  { %v208_v15 = vmul.f32 %v204_v14, %v161_v13 }
  0x41   :  { %338 = shalt.err (!%p335_p6)
}
  0x42   :  { %s339_s22 = scalar_lea.hbm %s498_s2, 128 }
  0x43   :  { %p340_p7 = scmp.ne.s32.totalorder %s498_s2, %s339_s22  ;;  %p343_p8 = scmp.lt.u32.totalorder %s339_s22, %s498_s2 }
  0x45   :  { %p345_p9 = pnand %p343_p8, %p340_p7 }
  0x47   :  { %348 = shalt.err (!%p345_p9)
}
  0x48   :  { %232 = dma.vmem_to_hbm [thread:$0]  %s230_s14, 128, %s498_s2, [#allocation4]   ;;  %216 = vst [vmem:[#allocation8] sm:$0xff] %v208_v15 }
  0x49   :  { %s349_s29 = scalar_lea.vmem %s240_s16, 128  ;;  %p354_p11 = scmp.lt.s32.totalorder %s240_s16, %s240_s16 }
  0x4a   :  { %p350_p10 = scmp.ne.s32.totalorder %s240_s16, %s349_s29  ;;  %p355_p12 = scmp.lt.s32.totalorder %s349_s29, %s349_s29 }
  0x4c   :  { %p356_p13 = por %p355_p12, %p354_p11 }
  0x4e   :  { %p357_p0 = pnand %p356_p13, %p350_p10 }
  0x50   :  { %360 = shalt.err (!%p357_p0)
}
  0x51   :  { %s361_s6 = scalar_lea.hbm %s499_s3, 128 }
  0x52   :  { %p362_p1 = scmp.ne.s32.totalorder %s499_s3, %s361_s6  ;;  %p365_p2 = scmp.lt.u32.totalorder %s361_s6, %s499_s3 }
  0x54   :  { %p367_p3 = pnand %p365_p2, %p362_p1 }
  0x56   :  { %370 = shalt.err (!%p367_p3)
}
  0x57   :  { %242 = dma.vmem_to_hbm [thread:$0]  %s240_s16, 128, %s499_s3, [#allocation9]  }
  0x58   :  { %s371_s12 = scalar_lea.vmem %s250_s18, 128  ;;  %p376_p5 = scmp.lt.s32.totalorder %s250_s18, %s250_s18 }
  0x59   :  { %p372_p4 = scmp.ne.s32.totalorder %s250_s18, %s371_s12  ;;  %p377_p6 = scmp.lt.s32.totalorder %s371_s12, %s371_s12 }
  0x5b   :  { %p378_p7 = por %p377_p6, %p376_p5 }
  0x5d   :  { %p379_p8 = pnand %p378_p7, %p372_p4 }
  0x5f   :  { %382 = shalt.err (!%p379_p8)
}
  0x60   :  { %s383_s1 = scalar_lea.hbm %s500_s4, 128 }
  0x61   :  { %p384_p9 = scmp.ne.s32.totalorder %s500_s4, %s383_s1  ;;  %p387_p10 = scmp.lt.u32.totalorder %s383_s1, %s500_s4 }
  0x63   :  { %p389_p11 = pnand %p387_p10, %p384_p9 }
  0x65   :  { %392 = shalt.err (!%p389_p11)
}
  0x66   :  { %252 = dma.vmem_to_hbm [thread:$0]  %s250_s18, 128, %s500_s4, [#allocation9]  }
  0x67   :  { %397 = dma.done.wait [#allocation4], 128  }
  0x68   :  { %398 = vsyncadd [#allocation4], 4294967168 }
  0x69   :  { %399 = dma.done.wait [#allocation9], 256  }
  0x6a   :  { %400 = vsyncadd [#allocation9], 4294967040 }
  0x6b   :  { %262 = vsyncpa [#allocation3], 1 }
  0x6c   :  { %263 = vsyncpa [#allocation6], 1 }
  0x6d   :  { %264 = vsyncpa [#allocation4], 1 }
  0x6e   :  { %265 = vsyncpa [#allocation9], 1 }

</bundles_post_ra>
